<compile_context>
chip_gen: v6e
topology: v6e:2x2x1
jax: 0.10.0
libtpu: 0.0.40
codegen_flags: <defaults>
</compile_context>

<pallas_src>
import functools

import jax
import jax.numpy as jnp
from jax.experimental import pallas as pl
from jax.experimental.pallas import tpu as pltpu


def _choose_tiling(N, C, K, hw, *, target_bytes=4 << 20, max_tile_hw=65536):
    """Pick (tile_hw, nb): pixels per grid step and images per grid step.

    Targets ~`target_bytes` of f32 traffic (in + out) per grid step, never
    pads (tile_hw divides hw exactly or equals hw; nb divides N exactly),
    and keeps the grid at >= 2 steps when N > 1 so both v7x TensorCores get
    work.
    """
    bytes_per_px = (C + K) * 4  # f32 in + f32 out per pixel

    if hw * bytes_per_px <= target_bytes:
        # Whole image fits comfortably in one step -> no pixel tiling.
        tile_hw = hw
    else:
        # Largest multiple-of-128 divisor of hw within the target / max tile.
        tile_hw = hw  # fallback: whole image (always correct, no padding)
        limit = min(max_tile_hw, target_bytes // bytes_per_px, hw)
        best = 0
        d = 128
        while d <= limit:
            if hw % d == 0:
                best = d
            d += 128
        if best:
            tile_hw = best

    # Batch images per grid step only when a single (small) image is the
    # whole pixel tile; cap nb so the image-grid keeps >= 2 steps.
    nb = 1
    if tile_hw == hw and N > 1:
        per_image = hw * bytes_per_px
        max_nb = max(1, N // 2)
        for cand in range(1, N + 1):
            if (N % cand == 0 and cand <= max_nb
                    and cand * per_image <= target_bytes):
                nb = cand
    return tile_hw, nb


def _seg_probs_kernel(x_ref, wt_ref, b_ref, o_ref, *, use_sigmoid: bool):
    """Per-pixel 1x1 conv + bias, then softmax/sigmoid over classes.

    x_ref:  (nb, C, T)  channels x pixel-tile (pixels on the lane axis)
    wt_ref: (K, C)      transposed 1x1-conv weight (resident)
    b_ref:  (K, 1)      bias (resident)
    o_ref:  (nb, K, T)  per-pixel class probabilities
    """
    x = x_ref[...]            # (nb, C, T)
    wt = wt_ref[...]          # (K, C)
    b = b_ref[...]            # (K, 1)
    C = x.shape[1]

    # Unrolled C-contraction on the VPU: (1,K,1) * (nb,1,T) broadcast FMAs.
    # A CxK (e.g. 4x6) contraction is far too small to be worth the MXU.
    logits = b[None, :, :] + wt[None, :, 0:1] * x[:, 0:1, :]
    for c in range(1, C):
        logits = logits + wt[None, :, c:c + 1] * x[:, c:c + 1, :]

    if use_sigmoid:
        # logits_to_probabilities: sigmoid branch when nr_classes == 1
        probs = jax.nn.sigmoid(logits)
    else:
        # numerically-stable softmax over the class (sublane) axis
        m = jnp.max(logits, axis=1, keepdims=True)            # (nb, 1, T)
        e = jnp.exp(logits - m)                                # (nb, K, T)
        denom = jnp.sum(e, axis=1, keepdims=True)              # (nb, 1, T)
        probs = e * pl.reciprocal(denom, approx=True)          # EUP vrcp

    o_ref[...] = probs.astype(o_ref.dtype)


def base_model_forward(patches, weight, bias, *, nr_samples: int = 1):
    """Pallas implementation of BaseModel.forward.

    patches: (N, C, H, W) float32   (NCHW, matching the PyTorch module)
    weight:  (C, K) float32         synthetic 1x1-conv segmentation head
    bias:    (K,)   float32
    returns: (nr_samples, N, K, H, W) float32
    """
    N, C, H, W = patches.shape
    K = weight.shape[1]
    use_sigmoid = (K == 1)

    hw = H * W
    tile_hw, nb = _choose_tiling(N, C, K, hw)

    # NCHW -> (N, C, H*W): a pure reshape -- no transpose, no pad, no extra
    # HBM pass (tile_hw divides hw and nb divides N by construction).
    x = patches.reshape(N, C, hw)
    wt = weight.T                   # (K, C), tiny, resident in VMEM
    b2d = bias.reshape(K, 1)        # (K, 1)

    kernel = functools.partial(_seg_probs_kernel, use_sigmoid=use_sigmoid)

    probs = pl.pallas_call(
        kernel,
        out_shape=jax.ShapeDtypeStruct((N, K, hw), jnp.float32),
        grid_spec=pltpu.PrefetchScalarGridSpec(
            num_scalar_prefetch=0,
            grid=(N // nb, hw // tile_hw),
            in_specs=[
                pl.BlockSpec((nb, C, tile_hw), lambda n, j: (n, 0, j)),  # pixels
                pl.BlockSpec((K, C), lambda n, j: (0, 0)),               # weight
                pl.BlockSpec((K, 1), lambda n, j: (0, 0)),               # bias
            ],
            out_specs=pl.BlockSpec((nb, K, tile_hw), lambda n, j: (n, 0, j)),
        ),
        compiler_params=pltpu.CompilerParams(
            dimension_semantics=("parallel", "parallel"),
        ),
    )(x, wt, b2d)

    # Output is already (N, K, HW): reshape back spatially (free).
    probs_nkhw = probs.reshape(N, K, H, W)

    # probas[i] = probs for each of nr_samples (== 1, deterministic model).
    if nr_samples == 1:
        return probs_nkhw[None]
    return jnp.broadcast_to(probs_nkhw[None], (nr_samples, N, K, H, W))


if __name__ == "__main__":
    # Small shapes consistent with the module's forward: patches (N, C, H, W).
    N, C, H, W = 2, 4, 16, 16
    nr_classes = 6          # self.nr_classes from the config
    nr_samples = 1          # BaseModel fixes nr_samples = 1

    key = jax.random.PRNGKey(0)
    k_x, k_w, k_b = jax.random.split(key, 3)

    patches = jax.random.normal(k_x, (N, C, H, W), dtype=jnp.float32)
    # Deterministic synthetic weights for the segmentation head (1x1 conv C -> K).
    weight = jax.random.normal(k_w, (C, nr_classes), dtype=jnp.float32) * 0.1
    bias = jax.random.normal(k_b, (nr_classes,), dtype=jnp.float32) * 0.01

    probas = base_model_forward(patches, weight, bias, nr_samples=nr_samples)
    probas = jax.block_until_ready(probas)

    # Reference check in plain JAX (same math, no Pallas).
    logits_ref = jnp.einsum("nchw,ck->nkhw", patches, weight) + bias[None, :, None, None]
    probs_ref = jax.nn.softmax(logits_ref, axis=1)
    ref = jnp.broadcast_to(probs_ref[None], (nr_samples, N, nr_classes, H, W))

    assert probas.shape == (nr_samples, N, nr_classes, H, W)
    # Tolerance accounts for the EUP approximate reciprocal in the softmax
    # denominator (outputs are probabilities in [0, 1]).
    max_err = float(jnp.max(jnp.abs(probas - ref)))
    assert max_err < 1e-3, f"max abs error {max_err}"

    print("KERNEL_OK")
</pallas_src>

<mosaic_0001>
module attributes {stable_mosaic.version = 11 : i64} {
  func.func @_seg_probs_kernel(%arg0: i32, %arg1: i32, %arg2: memref<1x4x256xf32, #tpu.memory_space<vmem>>, %arg3: memref<6x4xf32, #tpu.memory_space<vmem>>, %arg4: memref<6x1xf32, #tpu.memory_space<vmem>>, %arg5: memref<1x6x256xf32, #tpu.memory_space<vmem>>) attributes {dimension_semantics = [#tpu.dimension_semantics<parallel>, #tpu.dimension_semantics<parallel>], iteration_bounds = array<i64: 2, 1>, scalar_prefetch = 0 : i64, scratch_operands = 0 : i64, tpu.core_type = #tpu.core_type<tc>, window_params = [{transform_indices = @transform_0, window_bounds = array<i64: 1, 4, 256>}, {pipeline_mode = #tpu.pipeline_mode<synchronous>, transform_indices = @transform_1, window_bounds = array<i64: 6, 4>}, {pipeline_mode = #tpu.pipeline_mode<synchronous>, transform_indices = @transform_2, window_bounds = array<i64: 6, 1>}, {transform_indices = @transform_3, window_bounds = array<i64: 1, 6, 256>}]} {
    %c0 = arith.constant 0 : index
    %c0_0 = arith.constant 0 : index
    %c0_1 = arith.constant 0 : index
    %0 = vector.load %arg2[%c0, %c0_0, %c0_1] : memref<1x4x256xf32, #tpu.memory_space<vmem>>, vector<1x4x256xf32>
    %c0_2 = arith.constant 0 : index
    %c0_3 = arith.constant 0 : index
    %1 = vector.load %arg3[%c0_2, %c0_3] : memref<6x4xf32, #tpu.memory_space<vmem>>, vector<6x4xf32>
    %c0_4 = arith.constant 0 : index
    %c0_5 = arith.constant 0 : index
    %2 = vector.load %arg4[%c0_4, %c0_5] : memref<6x1xf32, #tpu.memory_space<vmem>>, vector<6x1xf32>
    %3 = vector.shape_cast %2 : vector<6x1xf32> to vector<1x6x1xf32>
    %4 = vector.extract_strided_slice %1 {offsets = [0, 0], sizes = [6, 1], strides = [1, 1]} : vector<6x4xf32> to vector<6x1xf32>
    %5 = vector.shape_cast %4 : vector<6x1xf32> to vector<1x6x1xf32>
    %6 = vector.extract_strided_slice %0 {offsets = [0, 0, 0], sizes = [1, 1, 256], strides = [1, 1, 1]} : vector<1x4x256xf32> to vector<1x1x256xf32>
    %7 = vector.broadcast %5 : vector<1x6x1xf32> to vector<1x6x256xf32>
    %8 = vector.broadcast %6 : vector<1x1x256xf32> to vector<1x6x256xf32>
    %9 = arith.mulf %7, %8 : vector<1x6x256xf32>
    %10 = vector.broadcast %3 : vector<1x6x1xf32> to vector<1x6x256xf32>
    %11 = arith.addf %10, %9 : vector<1x6x256xf32>
    %12 = vector.extract_strided_slice %1 {offsets = [0, 1], sizes = [6, 1], strides = [1, 1]} : vector<6x4xf32> to vector<6x1xf32>
    %13 = vector.shape_cast %12 : vector<6x1xf32> to vector<1x6x1xf32>
    %14 = vector.extract_strided_slice %0 {offsets = [0, 1, 0], sizes = [1, 1, 256], strides = [1, 1, 1]} : vector<1x4x256xf32> to vector<1x1x256xf32>
    %15 = vector.broadcast %13 : vector<1x6x1xf32> to vector<1x6x256xf32>
    %16 = vector.broadcast %14 : vector<1x1x256xf32> to vector<1x6x256xf32>
    %17 = arith.mulf %15, %16 : vector<1x6x256xf32>
    %18 = arith.addf %11, %17 : vector<1x6x256xf32>
    %19 = vector.extract_strided_slice %1 {offsets = [0, 2], sizes = [6, 1], strides = [1, 1]} : vector<6x4xf32> to vector<6x1xf32>
    %20 = vector.shape_cast %19 : vector<6x1xf32> to vector<1x6x1xf32>
    %21 = vector.extract_strided_slice %0 {offsets = [0, 2, 0], sizes = [1, 1, 256], strides = [1, 1, 1]} : vector<1x4x256xf32> to vector<1x1x256xf32>
    %22 = vector.broadcast %20 : vector<1x6x1xf32> to vector<1x6x256xf32>
    %23 = vector.broadcast %21 : vector<1x1x256xf32> to vector<1x6x256xf32>
    %24 = arith.mulf %22, %23 : vector<1x6x256xf32>
    %25 = arith.addf %18, %24 : vector<1x6x256xf32>
    %26 = vector.extract_strided_slice %1 {offsets = [0, 3], sizes = [6, 1], strides = [1, 1]} : vector<6x4xf32> to vector<6x1xf32>
    %27 = vector.shape_cast %26 : vector<6x1xf32> to vector<1x6x1xf32>
    %28 = vector.extract_strided_slice %0 {offsets = [0, 3, 0], sizes = [1, 1, 256], strides = [1, 1, 1]} : vector<1x4x256xf32> to vector<1x1x256xf32>
    %29 = vector.broadcast %27 : vector<1x6x1xf32> to vector<1x6x256xf32>
    %30 = vector.broadcast %28 : vector<1x1x256xf32> to vector<1x6x256xf32>
    %31 = arith.mulf %29, %30 : vector<1x6x256xf32>
    %32 = arith.addf %25, %31 : vector<1x6x256xf32>
    %cst = arith.constant dense<0xFF800000> : vector<1x256xf32>
    %33 = vector.multi_reduction <maximumf>, %32, %cst [1] : vector<1x6x256xf32> to vector<1x256xf32>
    %34 = vector.shape_cast %33 : vector<1x256xf32> to vector<1x1x256xf32>
    %35 = vector.broadcast %34 : vector<1x1x256xf32> to vector<1x6x256xf32>
    %36 = arith.subf %32, %35 : vector<1x6x256xf32>
    %37 = math.exp %36 : vector<1x6x256xf32>
    %cst_6 = arith.constant dense<0.000000e+00> : vector<1x256xf32>
    %38 = vector.multi_reduction <add>, %37, %cst_6 [1] : vector<1x6x256xf32> to vector<1x256xf32>
    %39 = vector.shape_cast %38 : vector<1x256xf32> to vector<1x1x256xf32>
    %40 = tpu.reciprocal %39 {approx = true} : vector<1x1x256xf32> -> vector<1x1x256xf32>
    %41 = vector.broadcast %40 : vector<1x1x256xf32> to vector<1x6x256xf32>
    %42 = arith.mulf %37, %41 : vector<1x6x256xf32>
    %c0_7 = arith.constant 0 : index
    %c0_8 = arith.constant 0 : index
    %c0_9 = arith.constant 0 : index
    %43 = vector.load %arg5[%c0_7, %c0_8, %c0_9] : memref<1x6x256xf32, #tpu.memory_space<vmem>>, vector<1x6x256xf32>
    tpu.vector_store %arg5[%c0_7, %c0_8, %c0_9], %42 {strides = array<i32>} : memref<1x6x256xf32, #tpu.memory_space<vmem>>, vector<1x6x256xf32>,
    return
  }
  func.func @transform_0(%arg0: i32, %arg1: i32) -> (i32, i32, i32) {
    %c0_i32 = arith.constant 0 : i32
    %c0_i32_0 = arith.constant 0 : i32
    return %arg0, %c0_i32, %arg1 : i32, i32, i32
  }
  func.func @transform_1(%arg0: i32, %arg1: i32) -> (i32, i32) {
    %c0_i32 = arith.constant 0 : i32
    %c0_i32_0 = arith.constant 0 : i32
    %c0_i32_1 = arith.constant 0 : i32
    return %c0_i32, %c0_i32_0 : i32, i32
  }
  func.func @transform_2(%arg0: i32, %arg1: i32) -> (i32, i32) {
    %c0_i32 = arith.constant 0 : i32
    %c0_i32_0 = arith.constant 0 : i32
    %c0_i32_1 = arith.constant 0 : i32
    return %c0_i32, %c0_i32_0 : i32, i32
  }
  func.func @transform_3(%arg0: i32, %arg1: i32) -> (i32, i32, i32) {
    %c0_i32 = arith.constant 0 : i32
    %c0_i32_0 = arith.constant 0 : i32
    return %arg0, %c0_i32, %arg1 : i32, i32, i32
  }
}

</mosaic_0001>

<bundles_post_ra>
// kernel: tpu_custom_call.1
= control target key start
LH: loop header
LB: loop body
LE: loop exit
PB: predicated region body
PF: predicated region fallthrough
CT: control target
= control target key end

     0   :  { %s553_s12 = smov 0   ;;  %s555_s13 = smov 0   ;;  %s600_s0 = inlined_call_operand.vmem [shape: f32[2,4,256], index: 0, kind: input, shape index: {}]   ;;  %s601_s1 = inlined_call_operand.vmem [shape: f32[6,4], index: 1, kind: input, shape index: {}]   ;;  %s602_s2 = inlined_call_operand.vmem [shape: f32[6,1], index: 2, kind: input, shape index: {}]   ;;  %s603_s3 = inlined_call_operand.vmem [shape: f32[2,6,256], index: 3, kind: output, shape index: {}]  }
   0x1   :  { %s557_s14 = smov 0  }
   0x2 LB: > { %s25_s15 = sadd.s32 1, %s523_s13  ;;  %p456_p0 = scmp.ge.s32.totalorder %s527_s14, 1  ;;  %s527_s14 = sphi %s557_s14, %s13_s14   ;;  %s523_s13 = sphi %s555_s13, %s605_s13   ;;  %s519_s12 = sphi %s553_s12, %s604_s12  }
   0x3   : > { %p27_p1 = scmp.ge.s32.totalorder %s25_s15, 2  ;;  %p158_p2 = scmp.lt.s32.totalorder %s527_s14, 3 }
   0x5   : > { %s607_s15 = smov (%p27_p1, %s25_s15), 0  ;;  %p159_p3 = pnand %p456_p0, %p158_p2 }
   0x6   : > { %p191_p4 = scmp.lt.s32.totalorder (!%p159_p3), %s519_s12, 1 }
   0x7   : > { %162 = sbr.rel (%p159_p3) target bundleno = 213 (0xd5), region = 32 }
   0xc   : > { %v211_v0 = vld [vmem:[%s601_s1] sm:$0x3f]  ;;  %v529_v1 = vmov 0   ;;  %v530_v2 = vmov 1   ;;  %v531_v4 = vmov 2   ;;  %v532_v5 = vmov 3  }
   0xd   : > { %493 = vset.pattern.permute.xlu0 %v529_v1  ;;  %494 = vset.pattern.permute.xlu1 %v530_v2  ;;  %v212_v3 = vld [vmem:[%s602_s2] sm:$0x3f]  ;;  %s609_s12 = smov (!%p191_p4, %s519_s12), 1  ;;  %v219_v6 = vlaneseq  ;;  %vm324_vm0 = vcmask 1045504  }
   0xe   : > { %215 = vperm.xlu0 %493, %v211_v0   ;;  %247 = vperm.xlu1 %494, %v211_v0   ;;  %s463_s20 = sshll.u32 %s609_s12, 3  ;;  %s464_s24 = sshll.u32 %s609_s12, 4 }
   0xf   : > { %v220_v7 = vshrl.u32 %v219_v6, 7  ;;  %s198_s23 = scalar_lea.vmem %s600_s0, %s463_s20  ;;  %s208_s27 = scalar_lea.vmem %s603_s3, %s464_s24 }
  0x10   : > { %v210_v10 = vld [vmem:[%s198_s23] sm:$0xff] }
  0x11   : > { %v221_v8 = vsub.s32 0, %v220_v7  ;;  %v225_v9 = vsub.s32 4, %v220_v7  ;;  %v252_v11 = vsub.s32 1, %v220_v7  ;;  %v256_v12 = vsub.s32 5, %v220_v7 }
  0x12   : > { %241 = vperm.xlu0 %493, %v212_v3   ;;  %495 = vset.pattern.permute.xlu1 %v531_v4  ;;  %v278_v13 = vsub.s32 2, %v220_v7  ;;  %v282_v14 = vsub.s32 6, %v220_v7  ;;  %v304_v21 = vsub.s32 3, %v220_v7  ;;  %v308_v22 = vsub.s32 7, %v220_v7 }
  0x13   : > { %273 = vperm.xlu1 %495, %v211_v0   ;;  %v222_v15 = vrot.slane %v210_v10, %v221_v8  ;;  %v226_v16 = vrot.slane %v210_v10, %v225_v9  ;;  %v253_v17 = vrot.slane %v210_v10, %v252_v11  ;;  %v257_v18 = vrot.slane %v210_v10, %v256_v12 }
  0x14   : > { %v279_v19 = vrot.slane %v210_v10, %v278_v13  ;;  %v283_v20 = vrot.slane %v210_v10, %v282_v14  ;;  %v305_v31 = vrot.slane %v210_v10, %v304_v21  ;;  %v309_v32 = vrot.slane %v210_v10, %v308_v22 }
  0x15   : > { %v232_v23 = vrot.slane %v222_v15, %v221_v8  ;;  %v236_v24 = vrot.slane %v226_v16, %v221_v8  ;;  %v263_v27 = vrot.slane %v253_v17, %v252_v11  ;;  %v267_v28 = vrot.slane %v257_v18, %v252_v11 }
  0x16   : > { %496 = vset.pattern.permute.xlu0 %v532_v5  ;;  %v289_v29 = vrot.slane %v279_v19, %v278_v13  ;;  %v293_v30 = vrot.slane %v283_v20, %v278_v13  ;;  %v315_v43 = vrot.slane %v305_v31, %v304_v21  ;;  %v319_v44 = vrot.slane %v309_v32, %v304_v21 }
  0x17   : > { %299 = vperm.xlu0 %496, %v211_v0  }
  0x89   : > { %v216_v25 = vpop.permute.xlu0 %215  ;;  %v248_v26 = vpop.permute.xlu1 %247 }
  0x8a   : > { %v237_v33 = vmul.f32 %v232_v23, %v216_v25  ;;  %v238_v34 = vmul.f32 %v236_v24, %v216_v25  ;;  %v268_v36 = vmul.f32 %v263_v27, %v248_v26  ;;  %v269_v37 = vmul.f32 %v267_v28, %v248_v26 }
  0x8d   : > { %v242_v35 = vpop.permute.xlu0 %241 }
  0x8e   : > { %v244_v38 = vadd.f32 %v242_v35, %v237_v33  ;;  %v245_v39 = vadd.f32 %v242_v35, %v238_v34  ;;  %v274_v40 = vpop.permute.xlu1 %273 }
  0x8f   : > { %v294_v41 = vmul.f32 %v289_v29, %v274_v40  ;;  %v295_v42 = vmul.f32 %v293_v30, %v274_v40 }
  0x90   : > { %v270_v45 = vadd.f32 %v268_v36, %v244_v38  ;;  %v271_v46 = vadd.f32 %v269_v37, %v245_v39 }
  0x92   : > { %v296_v47 = vadd.f32 %v294_v41, %v270_v45  ;;  %v297_v48 = vadd.f32 %v295_v42, %v271_v46  ;;  %v300_v49 = vpop.permute.xlu0 %299 }
  0x93   : > { %v320_v50 = vmul.f32 %v315_v43, %v300_v49  ;;  %v321_v51 = vmul.f32 %v319_v44, %v300_v49 }
  0x95   : > { %v322_v52 = vadd.f32 %v320_v50, %v296_v47  ;;  %v323_v53 = vadd.f32 %v321_v51, %v297_v48 }
  0x97   : > { %v325_v54 = vsel %vm324_vm0, %v322_v52, -inf  ;;  %v332_v55 = vsel %vm324_vm0, %v323_v53, -inf }
  0x98   : > { %v326_v56 = vrot.slane %v325_v54, 4  ;;  %v333_v57 = vrot.slane %v332_v55, 4 }
  0x9a   : > { %v327_v58 = vmax.f32 %v325_v54, %v326_v56  ;;  %v334_v59 = vmax.f32 %v332_v55, %v333_v57 }
  0x9c   : > { %v328_v60 = vrot.slane %v327_v58, 2  ;;  %v335_v61 = vrot.slane %v334_v59, 2 }
  0x9e   : > { %v329_v62 = vmax.f32 %v327_v58, %v328_v60  ;;  %v336_v63 = vmax.f32 %v334_v59, %v335_v61 }
  0xa0   : > { %v330_v0 = vrot.slane %v329_v62, 1  ;;  %v337_v1 = vrot.slane %v336_v63, 1 }
  0xa2   : > { %v331_v2 = vmax.f32 %v329_v62, %v330_v0  ;;  %v338_v3 = vmax.f32 %v336_v63, %v337_v1 }
  0xa4   : > { %v339_v4 = vsub.f32 %v322_v52, %v331_v2  ;;  %v340_v5 = vsub.f32 %v323_v53, %v338_v3 }
  0xa6   : > { %v341_v6 = vmul.f32 1.442695, %v339_v4  ;;  %v343_v7 = vmul.f32 1.442695, %v340_v5 }
  0xa8   : > { %497 = vpow2.f32 %v341_v6 }
  0xa9   : > { %499 = vpow2.f32 %v343_v7 }
  0xb5   : > { %v498_v8 = vpop.eup %497 }
  0xb6   : > { %v500_v9 = vpop.eup %499  ;;  %v345_v10 = vsel %vm324_vm0, %v498_v8, 0.0 }
  0xb7   : > { %v346_v11 = vrot.slane %v345_v10, 4  ;;  %v352_v12 = vsel %vm324_vm0, %v500_v9, 0.0 }
  0xb8   : > { %v353_v13 = vrot.slane %v352_v12, 4 }
  0xb9   : > { %v347_v14 = vadd.f32 %v346_v11, %v345_v10 }
  0xba   : > { %v354_v15 = vadd.f32 %v353_v13, %v352_v12 }
  0xbb   : > { %v348_v16 = vrot.slane %v347_v14, 2 }
  0xbc   : > { %v355_v17 = vrot.slane %v354_v15, 2 }
  0xbd   : > { %v349_v18 = vadd.f32 %v348_v16, %v347_v14 }
  0xbe   : > { %v356_v19 = vadd.f32 %v355_v17, %v354_v15 }
  0xbf   : > { %v350_v20 = vrot.slane %v349_v18, 1 }
  0xc0   : > { %v357_v21 = vrot.slane %v356_v19, 1 }
  0xc1   : > { %v351_v22 = vadd.f32 %v350_v20, %v349_v18 }
  0xc2   : > { %v358_v23 = vadd.f32 %v357_v21, %v356_v19 }
  0xc3   : > { %501 = vrcp.f32 %v351_v22 }
  0xc4   : > { %503 = vrcp.f32 %v358_v23 }
  0xd0   : > { %v502_v24 = vpop.eup %501 }
  0xd1   : > { %v504_v25 = vpop.eup %503  ;;  %v361_v26 = vmul.f32 %v502_v24, %v498_v8 }
  0xd2   : > { %v362_v27 = vmul.f32 %v504_v25, %v500_v9 }
  0xd3   : > { %363 = vst [vmem:[%s208_s27] sm:$0x3f] %v361_v26 }
  0xd4   : > { %364 = vst [vmem:[%s208_s27 + $0x8] sm:$0x3f] %v362_v27 }
  0xd5 PF: > { %s13_s14 = sadd.s32 1, %s527_s14   ;;  %s604_s12 = smov %s523_s13 }
  0xd6   : > { %p10_p5 = scmp.ge.s32.totalorder %s13_s14, 4   ;;  %s605_s13 = smov %s607_s15 }
  0xd8   :  { %12 = sbr.rel (!%p10_p5) target bundleno = 2 (0x2), region = 62 }

</bundles_post_ra>
